<compile_context>
chip_gen: v7x
topology: tpu7x:2x2x1
jax: 0.10.0
libtpu: 0.0.40
codegen_flags: <defaults>
</compile_context>

<pallas_src>
import jax
import jax.numpy as jnp
from jax.experimental import pallas as pl
from jax.experimental.pallas import tpu as pltpu

LANE = 128


def _round_up(x, m):
    return (x + m - 1) // m * m


def _linear_kernel(b_ref, w_ref, xT_ref, oT_ref):
    # b_ref : SMEM (1,)     float32   bias scalar
    # w_ref : VMEM (F, 1)   float32   weight column (lane-broadcast in-kernel)
    # xT_ref: VMEM (F, TB)            batch on the 128-lane axis
    # oT_ref: VMEM (1, TB)            lane-dense output slab
    x = xT_ref[...].astype(jnp.float32)           # (F, TB), upconvert if bf16
    w = w_ref[...].astype(jnp.float32)            # (F, 1) -> broadcast over lanes
    acc = jnp.sum(x * w, axis=0, keepdims=True)   # sublane reduce (XLU) -> (1, TB)
    oT_ref[...] = (acc + b_ref[0]).astype(oT_ref.dtype)


def simple_model_forward_transposed(xT, weight, bias, *,
                                    max_tile_b=32768, target_tiles=8):
    """nn.Linear(10, 1) forward on a pre-transposed input.

    xT: (10, B) with batch on the last (lane) axis — ideally emitted directly
    by the producer so no extra HBM transpose pass is needed.
    weight: (1, 10), bias: (1,).  Returns (B, 1) in xT.dtype.
    """
    F, B = xT.shape
    assert weight.shape == (1, F)
    assert bias.shape == (1,)

    # Tile choice: as large as possible (amortize the ~0.35us per-step
    # overhead) but capped so big batches still give >= target_tiles grid
    # steps for megacore sharding on v7x.  Always a multiple of 128 lanes.
    b_aligned = _round_up(B, LANE)
    TB = min(max_tile_b,
             max(LANE, _round_up(-(-b_aligned // target_tiles), LANE)))
    B_pad = _round_up(B, TB)
    num_tiles = B_pad // TB

    if B_pad != B:
        # Padded lanes compute bias-only values and are sliced off below.
        xT = jnp.pad(xT, ((0, 0), (0, B_pad - B)))

    w_col = weight.reshape(F, 1).astype(jnp.float32)
    b_flat = bias.reshape(1).astype(jnp.float32)

    itemsize = jnp.dtype(xT.dtype).itemsize
    cost = pl.CostEstimate(
        flops=2 * F * B_pad,
        transcendentals=0,
        bytes_accessed=int(F * B_pad * itemsize + B_pad * itemsize + F * 4 + 4),
    )

    oT = pl.pallas_call(
        _linear_kernel,
        out_shape=jax.ShapeDtypeStruct((1, B_pad), xT.dtype),
        grid=(num_tiles,),
        in_specs=[
            # bias: tiny scalar, lives in SMEM.
            pl.BlockSpec(memory_space=pltpu.MemorySpace.SMEM),
            # weight column: tiny (F, 1) VMEM operand, same block every step.
            pl.BlockSpec((F, 1), lambda i: (0, 0)),
            # x^T tiled over the batch (lane) axis; double-buffered by Pallas.
            pl.BlockSpec((F, TB), lambda i: (0, i)),
        ],
        out_specs=pl.BlockSpec((1, TB), lambda i: (0, i)),
        compiler_params=pltpu.CompilerParams(
            dimension_semantics=("parallel",),
        ),
        cost_estimate=cost,
    )(b_flat, w_col, xT)

    # Back to the PyTorch-facing (B, 1) layout.
    return oT[:, :B].T


def simple_model_forward(x, weight, bias, *, min_pallas_batch=2048,
                         max_tile_b=32768, target_tiles=8):
    """Pallas equivalent of SimpleModel.forward: (B, 10) @ (10, 1).T + bias."""
    B, F = x.shape
    assert weight.shape == (1, F)
    assert bias.shape == (1,)

    if B < min_pallas_batch:
        # One tile's worth of work: launch + layout copies dominate, plain XLA
        # fusion is at least as fast.  (Pallas path still reachable by setting
        # min_pallas_batch=0.)
        return (jnp.dot(x, weight.T) + bias).astype(x.dtype)

    # NOTE: for peak end-to-end bandwidth the upstream producer should emit x
    # already as (10, B) and call simple_model_forward_transposed directly;
    # the x.T here costs one extra HBM read+write pass.
    return simple_model_forward_transposed(
        x.T, weight, bias, max_tile_b=max_tile_b, target_tiles=target_tiles)


if __name__ == "__main__":
    key = jax.random.PRNGKey(0)
    kx, kw, kb, kx2 = jax.random.split(key, 4)

    B, IN, OUT = 8, 10, 1

    # Deterministic PyTorch-style init: uniform(-1/sqrt(in), 1/sqrt(in)).
    bound = 1.0 / jnp.sqrt(jnp.float32(IN))
    weight = jax.random.uniform(kw, (OUT, IN), jnp.float32, -bound, bound)
    bias = jax.random.uniform(kb, (OUT,), jnp.float32, -bound, bound)

    # 1) Small-batch case (matches the test module's usage): XLA fast path.
    x = jax.random.normal(kx, (B, IN), jnp.float32)
    y = jax.block_until_ready(simple_model_forward(x, weight, bias))
    y_ref = x @ weight.T + bias
    assert y.shape == (B, OUT)
    assert jnp.allclose(y, y_ref, atol=1e-5, rtol=1e-5)

    # 2) Same small batch, forcing the Pallas kernel (single 128-lane tile).
    y_p = jax.block_until_ready(
        simple_model_forward(x, weight, bias, min_pallas_batch=0))
    assert y_p.shape == (B, OUT)
    assert jnp.allclose(y_p, y_ref, atol=1e-5, rtol=1e-5)

    # 3) Non-aligned batch, forcing the Pallas kernel: exercises padding and a
    #    multi-tile "parallel" grid (600 -> 640 padded lanes -> 5 tiles of 128).
    B2 = 600
    x2 = jax.random.normal(kx2, (B2, IN), jnp.float32)
    y2 = jax.block_until_ready(
        simple_model_forward(x2, weight, bias, min_pallas_batch=0))
    y2_ref = x2 @ weight.T + bias
    assert y2.shape == (B2, OUT)
    assert jnp.allclose(y2, y2_ref, atol=1e-5, rtol=1e-5)

    # 4) Producer-fused layout: pre-transposed (10, B) input, no wrapper pass.
    y2_t = jax.block_until_ready(
        simple_model_forward_transposed(x2.T, weight, bias))
    assert y2_t.shape == (B2, OUT)
    assert jnp.allclose(y2_t, y2_ref, atol=1e-5, rtol=1e-5)

    print("KERNEL_OK")
</pallas_src>

<mosaic_0001>
module attributes {stable_mosaic.version = 11 : i64} {
  func.func @_linear_kernel(%arg0: i32, %arg1: memref<1xf32, #tpu.memory_space<smem>>, %arg2: memref<10x1xf32, #tpu.memory_space<vmem>>, %arg3: memref<10x128xf32, #tpu.memory_space<vmem>>, %arg4: memref<1x128xf32, #tpu.memory_space<vmem>>) attributes {dimension_semantics = [#tpu.dimension_semantics<parallel>], iteration_bounds = array<i64: 1>, scalar_prefetch = 0 : i64, scratch_operands = 0 : i64, tpu.core_type = #tpu.core_type<tc>, window_params = [{transform_indices = @transform_0, window_bounds = array<i64: 1>}, {pipeline_mode = #tpu.pipeline_mode<synchronous>, transform_indices = @transform_1, window_bounds = array<i64: 10, 1>}, {transform_indices = @transform_2, window_bounds = array<i64: 10, 128>}, {transform_indices = @transform_3, window_bounds = array<i64: 1, 128>}]} {
    %c0 = arith.constant 0 : index
    %c0_0 = arith.constant 0 : index
    %0 = vector.load %arg3[%c0, %c0_0] : memref<10x128xf32, #tpu.memory_space<vmem>>, vector<10x128xf32>
    %c0_1 = arith.constant 0 : index
    %c0_2 = arith.constant 0 : index
    %1 = vector.load %arg2[%c0_1, %c0_2] : memref<10x1xf32, #tpu.memory_space<vmem>>, vector<10x1xf32>
    %2 = vector.broadcast %1 : vector<10x1xf32> to vector<10x128xf32>
    %3 = arith.mulf %0, %2 : vector<10x128xf32>
    %cst = arith.constant dense<0.000000e+00> : vector<128xf32>
    %4 = vector.multi_reduction <add>, %3, %cst [0] : vector<10x128xf32> to vector<128xf32>
    %5 = vector.shape_cast %4 : vector<128xf32> to vector<1x128xf32>
    %c0_3 = arith.constant 0 : index
    %6 = memref.load %arg1[%c0_3] : memref<1xf32, #tpu.memory_space<smem>>
    %7 = vector.broadcast %6 : f32 to vector<1x128xf32>
    %8 = arith.addf %5, %7 : vector<1x128xf32>
    %c0_4 = arith.constant 0 : index
    %c0_5 = arith.constant 0 : index
    %9 = vector.load %arg4[%c0_4, %c0_5] : memref<1x128xf32, #tpu.memory_space<vmem>>, vector<1x128xf32>
    tpu.vector_store %arg4[%c0_4, %c0_5], %8 {strides = array<i32>} : memref<1x128xf32, #tpu.memory_space<vmem>>, vector<1x128xf32>,
    return
  }
  func.func @transform_0(%arg0: i32) -> i32 {
    %c0_i32 = arith.constant 0 : i32
    %c0_i32_0 = arith.constant 0 : i32
    return %c0_i32 : i32
  }
  func.func @transform_1(%arg0: i32) -> (i32, i32) {
    %c0_i32 = arith.constant 0 : i32
    %c0_i32_0 = arith.constant 0 : i32
    %c0_i32_1 = arith.constant 0 : i32
    return %c0_i32, %c0_i32_0 : i32, i32
  }
  func.func @transform_2(%arg0: i32) -> (i32, i32) {
    %c0_i32 = arith.constant 0 : i32
    %c0_i32_0 = arith.constant 0 : i32
    return %c0_i32, %arg0 : i32, i32
  }
  func.func @transform_3(%arg0: i32) -> (i32, i32) {
    %c0_i32 = arith.constant 0 : i32
    %c0_i32_0 = arith.constant 0 : i32
    return %c0_i32, %arg0 : i32, i32
  }
}

</mosaic_0001>

<bundles_post_ra>
// kernel: tpu_custom_call.1
= control target key start
LH: loop header
LB: loop body
LE: loop exit
PB: predicated region body
PF: predicated region fallthrough
CT: control target
= control target key end

     0   :  { %v86_v1 = vmov 0   ;;  %s135_s0 = inlined_call_operand.<no memory space> [shape: f32[1], index: 0, kind: input, shape index: {}]   ;;  %s136_s1 = inlined_call_operand.vmem [shape: f32[10,1], index: 1, kind: input, shape index: {}]   ;;  %s137_s2 = inlined_call_operand.vmem [shape: f32[10,128], index: 2, kind: input, shape index: {}]   ;;  %s138_s3 = inlined_call_operand.hbm [shape: f32[1,128], index: 3, kind: output, shape index: {}]  }
   0x1   :  { %v19_v0 = vld [vmem:[%s136_s1 + $0x8] sm:$0x3]  ;;  %61 = vset.pattern.permute.xlu0 %v86_v1 }
   0x2   :  { %9 = vsyncpa [#allocation4], 0  ;;  %27 = vperm.xlu0 %61, %v19_v0   ;;  %v18_v2 = vld [vmem:[%s136_s1] sm:$0xff]  ;;  %v17_v3 = vld [vmem:[%s137_s2 + $0x8] sm:$0x3]  ;;  %vm32_vm0 = vcmask 1041408   ;;  %v42_v16 = vstv %s135_s0 }
   0x3   :  { %v16_v6 = vld [vmem:[%s137_s2] sm:$0xff]  ;;  %s87_s21 = smov [#allocation3]  }
   0x4   :  { %s51_s22 = sshll.u32 %s87_s21, 4  ;;  %s52_s22 = int_to_ptr.vmem [resolvable:$true] %s51_s22 }
   0x5   :  { %s62_s2 = scalar_lea.vmem %s52_s22, 16  ;;  %s66_s23 = scalar_lea.vmem %s52_s22, 32 }
   0x6   :  { %22 = vperm.xlu0 %61, %v18_v2   ;;  %p63_p0 = scmp.ne.s32.totalorder %s52_s22, %s62_s2  ;;  %p67_p1 = scmp.lt.s32.totalorder %s52_s22, %s52_s22 }
   0x7   :  { %p68_p2 = scmp.lt.s32.totalorder %s66_s23, %s62_s2 }
   0x9   :  { %p69_p3 = por %p68_p2, %p67_p1 }
   0xb   :  { %p70_p4 = pnand %p69_p3, %p63_p0 }
  0x81   :  { %v28_v4 = vpop.permute.xlu0 %27 }
  0x82   :  { %v31_v5 = vmul.f32 %v28_v4, %v17_v3 }
  0x84   :  { %v33_v9 = vsel %vm32_vm0, %v31_v5, 0.0 }
  0x85   :  { %v23_v7 = vpop.permute.xlu0 %22 }
  0x86   :  { %v30_v8 = vmul.f32 %v23_v7, %v16_v6 }
  0x88   :  { %v34_v10 = vadd.f32 %v33_v9, %v30_v8 }
  0x8a   :  { %v35_v11 = vrot.slane %v34_v10, 4 }
  0x8c   :  { %v36_v12 = vadd.f32 %v35_v11, %v34_v10 }
  0x8e   :  { %v37_v13 = vrot.slane %v36_v12, 2 }
  0x90   :  { %v38_v14 = vadd.f32 %v37_v13, %v36_v12 }
  0x92   :  { %v39_v15 = vrot.slane %v38_v14, 1 }
  0x94   :  { %v40_v17 = vadd.f32 %v39_v15, %v38_v14 }
  0x96   :  { %v43_v18 = vadd.f32 %v42_v16, %v40_v17 }
  0x98   :  { %44 = vst [vmem:[#allocation3] sm:$0x1] %v43_v18 }
  0x99   :  { %73 = shalt.err (!%p70_p4)
}
  0x9a   :  { %s74_s26 = scalar_lea.hbm %s138_s3, 16 }
  0x9b   :  { %p75_p5 = scmp.ne.s32.totalorder %s138_s3, %s74_s26  ;;  %p78_p6 = scmp.lt.u32.totalorder %s74_s26, %s138_s3 }
  0x9d   :  { %p80_p7 = pnand %p78_p6, %p75_p5 }
  0x9f   :  { %83 = shalt.err (!%p80_p7)
}
  0xa0   :  { %54 = dma.vmem_to_hbm [thread:$0]  %s52_s22, 16, %s138_s3, [#allocation4]  }
  0xa1   :  { %84 = dma.done.wait [#allocation4], 16  }
  0xa2   :  { %85 = vsyncadd [#allocation4], 4294967280 }
  0xa3   :  { %58 = vsyncpa [#allocation4], 1 }

</bundles_post_ra>
